<compile_context>
chip_gen: v7x
topology: tpu7x:2x2x1
jax: 0.10.0
libtpu: 0.0.40
codegen_flags: <defaults>
</compile_context>

<pallas_src>
import jax
import jax.numpy as jnp
from jax.experimental import pallas as pl
from jax.experimental.pallas import tpu as pltpu


def _make_deepset_kernel(n_true, block_b):
    """Kernel factory; n_true is the (unpadded) set size used for the mean."""
    inv_n = 1.0 / float(n_true)

    def kernel(x_ref, wsum_ref, w2_ref, b1_ref, o_ref):
        # x_ref    : (block_b, Cin, N)   x.dtype
        # wsum_ref : (Cout, Cin)         x.dtype  (W1 + W2, summed in f32)
        # w2_ref   : (Cout, Cin)         f32
        # b1_ref   : (Cout, 1)           f32
        # o_ref    : (block_b, Cout, N)  x.dtype
        wsum = wsum_ref[...]
        w2 = w2_ref[...]
        b1 = b1_ref[...]

        def body(b, carry):
            xb = x_ref[b]                                             # (Cin, N)
            # Main matmul on the MXU, f32 accumulation, stationary 2-D weight.
            y = jnp.dot(wsum, xb, preferred_element_type=jnp.float32)  # (Cout, N)
            # Channel mean over the set axis (f32-accumulating lane reduce).
            mean = jnp.sum(xb, axis=-1, keepdims=True,
                           dtype=jnp.float32) * inv_n                 # (Cin, 1)
            # Rank-1 correction: W2 @ mean (tiny matvec, column-oriented so the
            # result broadcasts over lanes without any transpose).
            corr = jnp.dot(w2, mean,
                           preferred_element_type=jnp.float32)        # (Cout, 1)
            o_ref[b] = (y + (b1 - corr)).astype(o_ref.dtype)
            return carry

        jax.lax.fori_loop(0, block_b, body, 0, unroll=bool(block_b <= 8))

    return kernel


def _tpu_generation_info():
    """(vmem_capacity_bytes, has_two_tensorcores) with safe fallbacks."""
    vmem_cap = 64 * 1024 * 1024  # conservative default (v7x per-TC)
    try:
        vmem_cap = int(pltpu.get_tpu_info().vmem_capacity_bytes)
    except Exception:
        pass
    two_cores = False
    try:
        kind = jax.devices()[0].device_kind.lower()
        two_cores = "v7" in kind
    except Exception:
        two_cores = vmem_cap <= 80 * 1024 * 1024
    return vmem_cap, two_cores


def _largest_divisor_at_most(n, cap, prefer_even_quotient=False):
    """Largest divisor of n that is <= cap; optionally prefer even n//d."""
    cap = max(1, min(int(cap), int(n)))
    best = 1
    for d in range(cap, 0, -1):
        if n % d == 0:
            best = d
            break
    if prefer_even_quotient and (n // best) % 2 == 1:
        for d in range(best - 1, 0, -1):
            if n % d == 0 and (n // d) % 2 == 0:
                return d
    return best


def deepset_layer(x, w1, b1, w2, *, block_b=None):
    """DeepSetLayer forward.

    x: (B, Cin, N); w1, w2: (Cout, Cin) (Conv1d kernel_size=1 weights with the
    trailing k-dim squeezed); b1: (Cout,).  Returns (B, Cout, N) in x.dtype.
    """
    B, Cin, N = x.shape
    Cout = w1.shape[0]
    itemsize = jnp.dtype(x.dtype).itemsize

    vmem_cap, two_cores = _tpu_generation_info()

    # Tiny parameters, prepared in f32 for accuracy of the fused form.
    f32 = jnp.float32
    wsum = (w1.astype(f32) + w2.astype(f32)).astype(x.dtype)
    w2_f32 = w2.astype(f32)
    b1_col = b1.astype(f32).reshape(Cout, 1)

    # Batch elements per grid step: big enough to amortize ~0.35us/step and
    # give roofline-sized DMAs, small enough that double-buffered in+out tiles
    # (plus per-batch f32 temps) stay well inside this generation's VMEM.
    bytes_per_batch = (Cin + Cout) * N * itemsize
    if block_b is None:
        slab_budget = max(2 * 1024 * 1024, vmem_cap // 8)  # ~8 MiB v7x, ~16 MiB v5e/v6e
        target = max(1, slab_budget // max(1, bytes_per_batch))
        if two_cores and B >= 2:
            target = min(target, B // 2)   # keep >=2 steps so both v7x TCs work
        block_b = _largest_divisor_at_most(B, target, prefer_even_quotient=two_cores)
    block_b = int(max(1, min(block_b, B)))
    if B % block_b != 0:
        block_b = _largest_divisor_at_most(B, block_b, prefer_even_quotient=two_cores)
    grid_b = B // block_b

    io_bytes_per_step = block_b * bytes_per_batch
    # double-buffered I/O + per-batch f32 temps + headroom, capped per generation
    vmem_limit = int(min(max(16 * 1024 * 1024,
                             4 * io_bytes_per_step + 4 * 1024 * 1024),
                         (vmem_cap * 5) // 8))

    cost = pl.CostEstimate(
        flops=2 * B * Cout * Cin * (N + 1),
        transcendentals=0,
        bytes_accessed=B * (Cin + Cout) * N * itemsize
        + (2 * Cout * Cin + Cout) * 4,
    )

    out = pl.pallas_call(
        _make_deepset_kernel(N, block_b),
        out_shape=jax.ShapeDtypeStruct((B, Cout, N), x.dtype),
        grid_spec=pltpu.PrefetchScalarGridSpec(
            num_scalar_prefetch=0,
            grid=(grid_b,),
            in_specs=[
                # batch block of the input (full Cin / N extents -> always legal)
                pl.BlockSpec((block_b, Cin, N), lambda b: (b, 0, 0)),
                # grid-invariant parameters
                pl.BlockSpec((Cout, Cin), lambda b: (0, 0)),
                pl.BlockSpec((Cout, Cin), lambda b: (0, 0)),
                pl.BlockSpec((Cout, 1), lambda b: (0, 0)),
            ],
            out_specs=pl.BlockSpec((block_b, Cout, N), lambda b: (b, 0, 0)),
        ),
        compiler_params=pltpu.CompilerParams(
            dimension_semantics=("parallel",),
            vmem_limit_bytes=vmem_limit,
        ),
        cost_estimate=cost,
    )(x, wsum, w2_f32, b1_col)

    return out


def deepset_layer_ref(x, w1, b1, w2):
    """Pure-JAX reference mirroring the (unfused) PyTorch forward."""
    y1 = jnp.einsum("oi,bin->bon", w1, x) + b1[None, :, None]
    xc = x - x.mean(axis=2, keepdims=True)
    y2 = jnp.einsum("oi,bin->bon", w2, xc)
    return y1 + y2


if __name__ == "__main__":
    # Small shapes consistent with the module: batch=2, in_features=8,
    # out_features=16, set size (spatial) = 128.
    B, Cin, Cout, N = 2, 8, 16, 128

    key = jax.random.PRNGKey(0)
    kx, kw1, kb1, kw2 = jax.random.split(key, 4)

    x = jax.random.normal(kx, (B, Cin, N), dtype=jnp.float32)
    # Conv1d kernel_size=1 weights with the trailing k-dim squeezed: (Cout, Cin).
    w1 = jax.random.normal(kw1, (Cout, Cin), dtype=jnp.float32) * 0.1
    b1 = jax.random.normal(kb1, (Cout,), dtype=jnp.float32) * 0.1
    w2 = jax.random.normal(kw2, (Cout, Cin), dtype=jnp.float32) * 0.1

    out = deepset_layer(x, w1, b1, w2)
    out = jax.block_until_ready(out)

    ref = deepset_layer_ref(x, w1, b1, w2)
    assert out.shape == (B, Cout, N)
    assert jnp.allclose(out, ref, atol=1e-4, rtol=1e-4), "mismatch vs reference"

    print("KERNEL_OK")
</pallas_src>

<mosaic_0001>
module attributes {stable_mosaic.version = 11 : i64} {
  func.func @kernel(%arg0: i32, %arg1: memref<2x8x128xf32, #tpu.memory_space<vmem>>, %arg2: memref<16x8xf32, #tpu.memory_space<vmem>>, %arg3: memref<16x8xf32, #tpu.memory_space<vmem>>, %arg4: memref<16x1xf32, #tpu.memory_space<vmem>>, %arg5: memref<2x16x128xf32, #tpu.memory_space<vmem>>) attributes {dimension_semantics = [#tpu.dimension_semantics<parallel>], iteration_bounds = array<i64: 1>, scalar_prefetch = 0 : i64, scratch_operands = 0 : i64, tpu.core_type = #tpu.core_type<tc>, window_params = [{transform_indices = @transform_0, window_bounds = array<i64: 2, 8, 128>}, {pipeline_mode = #tpu.pipeline_mode<synchronous>, transform_indices = @transform_1, window_bounds = array<i64: 16, 8>}, {pipeline_mode = #tpu.pipeline_mode<synchronous>, transform_indices = @transform_2, window_bounds = array<i64: 16, 8>}, {pipeline_mode = #tpu.pipeline_mode<synchronous>, transform_indices = @transform_3, window_bounds = array<i64: 16, 1>}, {transform_indices = @transform_4, window_bounds = array<i64: 2, 16, 128>}]} {
    %c0 = arith.constant 0 : index
    %c0_0 = arith.constant 0 : index
    %0 = vector.load %arg2[%c0, %c0_0] : memref<16x8xf32, #tpu.memory_space<vmem>>, vector<16x8xf32>
    %c0_1 = arith.constant 0 : index
    %c0_2 = arith.constant 0 : index
    %1 = vector.load %arg3[%c0_1, %c0_2] : memref<16x8xf32, #tpu.memory_space<vmem>>, vector<16x8xf32>
    %c0_3 = arith.constant 0 : index
    %c0_4 = arith.constant 0 : index
    %2 = vector.load %arg4[%c0_3, %c0_4] : memref<16x1xf32, #tpu.memory_space<vmem>>, vector<16x1xf32>
    %c0_i32 = arith.constant 0 : i32
    %3 = arith.index_cast %c0_i32 : i32 to index
    %c0_5 = arith.constant 0 : index
    %c0_6 = arith.constant 0 : index
    %4 = vector.load %arg1[%3, %c0_5, %c0_6] : memref<2x8x128xf32, #tpu.memory_space<vmem>>, vector<1x8x128xf32>
    %5 = vector.shape_cast %4 : vector<1x8x128xf32> to vector<8x128xf32>
    %cst = arith.constant dense<0.000000e+00> : vector<16x128xf32>
    %6 = tpu.matmul %0, %5, %cst {dimension_numbers = #tpu.dot_dimension_numbers<[1], [0], [0], [1], [0, 0, 1, 1], [], []>} : vector<16x8xf32>, vector<8x128xf32>, vector<16x128xf32> -> vector<16x128xf32>
    %cst_7 = arith.constant dense<0.000000e+00> : vector<8xf32>
    %7 = vector.multi_reduction <add>, %5, %cst_7 [1] : vector<8x128xf32> to vector<8xf32>
    %8 = vector.shape_cast %7 : vector<8xf32> to vector<8x1xf32>
    %cst_8 = arith.constant 7.812500e-03 : f32
    %9 = vector.broadcast %cst_8 : f32 to vector<8x1xf32>
    %10 = arith.mulf %8, %9 : vector<8x1xf32>
    %cst_9 = arith.constant dense<0.000000e+00> : vector<16x1xf32>
    %11 = tpu.matmul %1, %10, %cst_9 {dimension_numbers = #tpu.dot_dimension_numbers<[1], [0], [0], [1], [0, 0, 1, 1], [], []>} : vector<16x8xf32>, vector<8x1xf32>, vector<16x1xf32> -> vector<16x1xf32>
    %12 = arith.subf %2, %11 : vector<16x1xf32>
    %13 = vector.broadcast %12 : vector<16x1xf32> to vector<16x128xf32>
    %14 = arith.addf %6, %13 : vector<16x128xf32>
    %15 = arith.index_cast %c0_i32 : i32 to index
    %c0_10 = arith.constant 0 : index
    %c0_11 = arith.constant 0 : index
    %16 = vector.load %arg5[%15, %c0_10, %c0_11] : memref<2x16x128xf32, #tpu.memory_space<vmem>>, vector<1x16x128xf32>
    %17 = vector.shape_cast %16 : vector<1x16x128xf32> to vector<16x128xf32>
    %18 = vector.shape_cast %14 : vector<16x128xf32> to vector<1x16x128xf32>
    tpu.vector_store %arg5[%15, %c0_10, %c0_11], %18 {strides = array<i32>} : memref<2x16x128xf32, #tpu.memory_space<vmem>>, vector<1x16x128xf32>,
    %c1_i32 = arith.constant 1 : i32
    %19 = arith.index_cast %c1_i32 : i32 to index
    %c0_12 = arith.constant 0 : index
    %c0_13 = arith.constant 0 : index
    %20 = vector.load %arg1[%19, %c0_12, %c0_13] : memref<2x8x128xf32, #tpu.memory_space<vmem>>, vector<1x8x128xf32>
    %21 = vector.shape_cast %20 : vector<1x8x128xf32> to vector<8x128xf32>
    %cst_14 = arith.constant dense<0.000000e+00> : vector<16x128xf32>
    %22 = tpu.matmul %0, %21, %cst_14 {dimension_numbers = #tpu.dot_dimension_numbers<[1], [0], [0], [1], [0, 0, 1, 1], [], []>} : vector<16x8xf32>, vector<8x128xf32>, vector<16x128xf32> -> vector<16x128xf32>
    %cst_15 = arith.constant dense<0.000000e+00> : vector<8xf32>
    %23 = vector.multi_reduction <add>, %21, %cst_15 [1] : vector<8x128xf32> to vector<8xf32>
    %24 = vector.shape_cast %23 : vector<8xf32> to vector<8x1xf32>
    %cst_16 = arith.constant 7.812500e-03 : f32
    %25 = vector.broadcast %cst_16 : f32 to vector<8x1xf32>
    %26 = arith.mulf %24, %25 : vector<8x1xf32>
    %cst_17 = arith.constant dense<0.000000e+00> : vector<16x1xf32>
    %27 = tpu.matmul %1, %26, %cst_17 {dimension_numbers = #tpu.dot_dimension_numbers<[1], [0], [0], [1], [0, 0, 1, 1], [], []>} : vector<16x8xf32>, vector<8x1xf32>, vector<16x1xf32> -> vector<16x1xf32>
    %28 = arith.subf %2, %27 : vector<16x1xf32>
    %29 = vector.broadcast %28 : vector<16x1xf32> to vector<16x128xf32>
    %30 = arith.addf %22, %29 : vector<16x128xf32>
    %31 = arith.index_cast %c1_i32 : i32 to index
    %c0_18 = arith.constant 0 : index
    %c0_19 = arith.constant 0 : index
    %32 = vector.load %arg5[%31, %c0_18, %c0_19] : memref<2x16x128xf32, #tpu.memory_space<vmem>>, vector<1x16x128xf32>
    %33 = vector.shape_cast %32 : vector<1x16x128xf32> to vector<16x128xf32>
    %34 = vector.shape_cast %30 : vector<16x128xf32> to vector<1x16x128xf32>
    tpu.vector_store %arg5[%31, %c0_18, %c0_19], %34 {strides = array<i32>} : memref<2x16x128xf32, #tpu.memory_space<vmem>>, vector<1x16x128xf32>,
    %c2_i32 = arith.constant 2 : i32
    return
  }
  func.func @transform_0(%arg0: i32) -> (i32, i32, i32) {
    %c0_i32 = arith.constant 0 : i32
    %c0_i32_0 = arith.constant 0 : i32
    %c0_i32_1 = arith.constant 0 : i32
    return %arg0, %c0_i32, %c0_i32_0 : i32, i32, i32
  }
  func.func @transform_1(%arg0: i32) -> (i32, i32) {
    %c0_i32 = arith.constant 0 : i32
    %c0_i32_0 = arith.constant 0 : i32
    %c0_i32_1 = arith.constant 0 : i32
    return %c0_i32, %c0_i32_0 : i32, i32
  }
  func.func @transform_2(%arg0: i32) -> (i32, i32) {
    %c0_i32 = arith.constant 0 : i32
    %c0_i32_0 = arith.constant 0 : i32
    %c0_i32_1 = arith.constant 0 : i32
    return %c0_i32, %c0_i32_0 : i32, i32
  }
  func.func @transform_3(%arg0: i32) -> (i32, i32) {
    %c0_i32 = arith.constant 0 : i32
    %c0_i32_0 = arith.constant 0 : i32
    %c0_i32_1 = arith.constant 0 : i32
    return %c0_i32, %c0_i32_0 : i32, i32
  }
  func.func @transform_4(%arg0: i32) -> (i32, i32, i32) {
    %c0_i32 = arith.constant 0 : i32
    %c0_i32_0 = arith.constant 0 : i32
    %c0_i32_1 = arith.constant 0 : i32
    return %arg0, %c0_i32, %c0_i32_0 : i32, i32, i32
  }
}

</mosaic_0001>

<bundles_post_ra>
// kernel: tpu_custom_call.1
= control target key start
LH: loop header
LB: loop body
LE: loop exit
PB: predicated region body
PF: predicated region fallthrough
CT: control target
= control target key end

     0   :  { %s535_s0 = inlined_call_operand.vmem [shape: f32[2,8,128], index: 0, kind: input, shape index: {}]   ;;  %s536_s1 = inlined_call_operand.vmem [shape: f32[16,8], index: 1, kind: input, shape index: {}]   ;;  %s537_s2 = inlined_call_operand.vmem [shape: f32[16,8], index: 2, kind: input, shape index: {}]   ;;  %s538_s3 = inlined_call_operand.vmem [shape: f32[16,1], index: 3, kind: input, shape index: {}]   ;;  %s539_s4 = inlined_call_operand.hbm [shape: f32[2,16,128], index: 4, kind: output, shape index: {}]  }
   0x1   :  { %v24_v0 = vld [vmem:[%s535_s0] sm:$0xff] }
   0x2   :  { %9 = vsyncpa [#allocation3], 0  ;;  %25 = vadd.xlane.f32.xlu0 %v24_v0  ;;  %417 = vmatprep.subr.mxu1 %v24_v0  ;;  %v395_v1 = vld [vmem:[%s535_s0 + $0x8] sm:$0xff]  ;;  %v20_v2 = vld [vmem:[%s537_s2] sm:$0xff]  ;;  %vm28_vm0 = vcmask 64512   ;;  %v462_v10 = vmov 0  }
   0x3   :  { %418 = vmatpush3.msra.mxu1 %v24_v0  ;;  %414 = vmatprep.mubr.msk.f32.mxu0 %vm28_vm0, %v20_v2  ;;  %v18_v3 = vld [vmem:[%s536_s1] sm:$0xff]  ;;  %v19_v4 = vld [vmem:[%s536_s1 + $0x8] sm:$0xff] }
   0x4   :  { %427 = vmatprep.subr.mxu1 %v395_v1  ;;  %419 = vmatprep.mubr.msk.f32.mxu1 %vm28_vm0, %v18_v3  ;;  %v21_v7 = vld [vmem:[%s537_s2 + $0x8] sm:$0xff]  ;;  %v22_v15 = vld [vmem:[%s538_s3] sm:$0xff] }
   0x5   :  { %420 = vmatmul.mubr.msk.f32.vlgmr.msra.gmra.mrb[0].mxu1 %vm28_vm0, %v19_v4  ;;  %436 = vset.pattern.permute.xlu1 %v462_v10  ;;  %v23_v11 = vld [vmem:[%s538_s3 + $0x8] sm:$0xff]  ;;  %s463_s3 = smov [#allocation2]  }
   0x6   :  { %207 = vadd.xlane.f32.xlu0 %v395_v1  ;;  %428 = vmatpush3.msra.mxu1 %v395_v1  ;;  %s380_s28 = sshll.u32 %s463_s3, 4  ;;  %s381_s28 = int_to_ptr.vmem [resolvable:$true] %s380_s28 }
   0x7   :  { %429 = vmatprep.mubr.msk.f32.mxu1 %vm28_vm0, %v18_v3  ;;  %437 = vset.pattern.permute.xlu0 %v462_v10  ;;  %s438_s29 = scalar_lea.vmem %s381_s28, 512  ;;  %p443_p1 = scmp.lt.s32.totalorder %s381_s28, %s381_s28 }
   0x8   :  { %p439_p0 = scmp.ne.s32.totalorder %s381_s28, %s438_s29  ;;  %p444_p2 = scmp.lt.s32.totalorder %s438_s29, %s438_s29 }
   0x9   :  { %430 = vmatmul.mubr.msk.f32.vlgmr.msra.gmra.mrb[2].mxu1 %vm28_vm0, %v19_v4 }
   0xa   :  { %p445_p3 = por %p444_p2, %p443_p1 }
   0xc   :  { %p446_p4 = pnand %p445_p3, %p439_p0 }
  0x8f   :  { %v26_v5 = vpop.xlane.xlu0 %25 }
  0x90   :  { %v27_v6 = vmul.f32 0.0078125, %v26_v5 }
  0x92   :  { %412 = vmatprep.subr.mxu0 %v27_v6 }
  0x93   :  { %413 = vmatpush3.msra.mxu0 %v27_v6  ;;  %v208_v8 = vpop.xlane.xlu0 %207 }
  0x94   :  { %v209_v9 = vmul.f32 0.0078125, %v208_v8  ;;  %415 = vmatmul.mubr.msk.f32.vlgmr.msra.gmra.mrb[0].mxu0 %vm28_vm0, %v21_v7 }
  0x95   :  { %424 = vmatprep.mubr.msk.f32.mxu0 %vm28_vm0, %v20_v2 }
  0x96   :  { %422 = vmatprep.subr.mxu0 %v209_v9 }
  0x97   :  { %423 = vmatpush3.msra.mxu0 %v209_v9 }
  0x98   :  { %425 = vmatmul.mubr.msk.f32.vlgmr.msra.gmra.mrb[2].mxu0 %vm28_vm0, %v21_v7 }
  0xd8   :  { %v421_v16 = vpop.f32.mrb[0].mxu1 }
  0xd9   :  { %v194_v20 = vpop.f32.mrb[1].mxu1 }
  0xdc   :  { %v431_v23 = vpop.f32.mrb[2].mxu1 }
  0xdd   :  { %v363_v24 = vpop.f32.mrb[3].mxu1 }
 0x167   :  { %v416_v12 = vpop.f32.mrb[0].mxu0 }
 0x168   :  { %v111_v13 = vsub.f32 %v23_v11, %v416_v12  ;;  %v101_v14 = vpop.f32.mrb[1].mxu0 }
 0x169   :  { %v110_v18 = vsub.f32 %v22_v15, %v101_v14 }
 0x16a   :  { %119 = vperm.xlu1 %436, %v111_v13  }
 0x16b   :  { %v426_v17 = vpop.f32.mrb[2].mxu0 }
 0x16c   :  { %v276_v19 = vpop.f32.mrb[3].mxu0  ;;  %v286_v22 = vsub.f32 %v23_v11, %v426_v17 }
 0x16d   :  { %v285_v21 = vsub.f32 %v22_v15, %v276_v19 }
 0x16e   :  { %114 = vperm.xlu1 %436, %v110_v18  }
 0x16f   :  { %289 = vperm.xlu0 %437, %v285_v21  }
 0x172   :  { %294 = vperm.xlu1 %436, %v286_v22  }
 0x1e9   :  { %v120_v25 = vpop.permute.xlu1 %119 }
 0x1ea   :  { %v200_v26 = vadd.f32 %v421_v16, %v120_v25 }
 0x1ec   :  { %204 = vst [vmem:[#allocation2 + $0x8] sm:$0xff] %v200_v26 }
 0x1ed   :  { %v115_v27 = vpop.permute.xlu1 %114 }
 0x1ee   :  { %v195_v28 = vadd.f32 %v194_v20, %v115_v27  ;;  %v290_v29 = vpop.permute.xlu0 %289 }
 0x1ef   :  { %v364_v30 = vadd.f32 %v363_v24, %v290_v29 }
 0x1f0   :  { %203 = vst [vmem:[#allocation2] sm:$0xff] %v195_v28 }
 0x1f1   :  { %373 = vst [vmem:[#allocation2 + $0x10] sm:$0xff] %v364_v30  ;;  %v295_v31 = vpop.permute.xlu1 %294 }
 0x1f2   :  { %v369_v32 = vadd.f32 %v431_v23, %v295_v31 }
 0x1f4   :  { %374 = vst [vmem:[#allocation2 + $0x18] sm:$0xff] %v369_v32 }
 0x1f5   :  { %449 = shalt.err (!%p446_p4)
}
 0x1f6   :  { %s450_s6 = scalar_lea.hbm %s539_s4, 512 }
 0x1f7   :  { %p451_p5 = scmp.ne.s32.totalorder %s539_s4, %s450_s6  ;;  %p454_p6 = scmp.lt.u32.totalorder %s450_s6, %s539_s4 }
 0x1f9   :  { %p456_p7 = pnand %p454_p6, %p451_p5 }
 0x1fb   :  { %459 = shalt.err (!%p456_p7)
}
 0x1fc   :  { %s464_s11 = smov 128   ;;  %s465_s12 = smov 8  }
 0x1fd   :  { %386 = dma.vmem_to_hbm [thread:$0]  %s381_s28, 512, %s539_s4, [#allocation3], %s464_s11, %s464_s11, %s465_s12  }
 0x1fe   :  { %460 = dma.done.wait [#allocation3], 512  }
 0x1ff   :  { %461 = vsyncadd [#allocation3], 4294966784 }
 0x200   :  { %390 = vsyncpa [#allocation3], 1 }

</bundles_post_ra>
